<compile_context>
chip_gen: v6e
topology: v6e:2x2x1
jax: 0.10.0
libtpu: 0.0.40
codegen_flags: <defaults>
</compile_context>

<pallas_src>
import functools

import numpy as np

import jax
import jax.numpy as jnp
from jax import lax
from jax.experimental import pallas as pl
from jax.experimental.pallas import tpu as pltpu


def _row_tile(n_rows: int) -> int:
    """Largest sublane-aligned row tile that evenly divides n_rows."""
    for t in (512, 256, 128, 64, 32, 16, 8):
        if n_rows % t == 0:
            return t
    return n_rows


# ----------------------------------------------------------------------------
# Kernels
# ----------------------------------------------------------------------------
def _qkv_proj_kernel(x_ref, w_ref, b_ref, k_out, v_out, q_out, *, d_model):
    # x: (tm, D) f32; w: (D, 3D) bf16 (q columns pre-scaled); b: (1, 3D) f32
    x = x_ref[...].astype(jnp.bfloat16)
    y = jnp.dot(x, w_ref[...], preferred_element_type=jnp.float32) + b_ref[...]
    D = d_model
    k_out[...] = y[:, :D].astype(k_out.dtype)
    v_out[...] = y[:, D:2 * D].astype(v_out.dtype)
    q_out[...] = y[:, 2 * D:].astype(q_out.dtype)


def _attention_kernel(q_ref, k_ref, v_ref, bias_ref, ctx_ref, attn_ref):
    # per batch element: q/k/v refs are (H, S, dph) bf16 (q already pre-scaled)
    # bias: (H, S, S) f32 additive mask (0 or -1e30), matches torch masked_fill.
    q = q_ref[...]
    k = k_ref[...]
    v = v_ref[...]
    s = jnp.einsum("hqd,hkd->hqk", q, k, preferred_element_type=jnp.float32)
    s = s + bias_ref[...]
    m = jnp.max(s, axis=-1, keepdims=True)
    p = jnp.exp(s - m)
    denom = jnp.sum(p, axis=-1, keepdims=True)
    attn = p * pl.reciprocal(denom, approx=True)        # softmax over keys
    attn_ref[...] = attn
    # dropout(p=0.0) is identity.
    ctx = jnp.einsum("hqk,hkd->hqd", attn.astype(v.dtype), v,
                     preferred_element_type=jnp.float32)
    ctx_ref[...] = ctx.astype(ctx_ref.dtype)
    # TODO(synk): for long sequences this should be flash-tiled over KV blocks;
    # here the full (S, S) attention matrix is a module output anyway.


def _out_ln_kernel(ctx_ref, res_ref, w_ref, b_ref, g_ref, beta_ref, out_ref, *, eps):
    # final linear + residual + LayerNorm of the attention block
    y = jnp.dot(ctx_ref[...], w_ref[...],
                preferred_element_type=jnp.float32) + b_ref[...]
    x = res_ref[...] + y                  # dropout p=0.0 = identity
    mean = jnp.mean(x, axis=-1, keepdims=True)
    var = jnp.mean(jnp.square(x - mean), axis=-1, keepdims=True)
    norm = (x - mean) * lax.rsqrt(var + eps)
    out_ref[...] = (norm * g_ref[...] + beta_ref[...]).astype(out_ref.dtype)


def _ffn_kernel(x_ref, w1_ref, b1_ref, w2_ref, b2_ref, g_ref, beta_ref, out_ref, *, eps):
    # fused: relu(x@W1+b1)@W2+b2 -> residual -> LayerNorm; hidden stays in VMEM
    x = x_ref[...]
    h = jnp.dot(x.astype(jnp.bfloat16), w1_ref[...],
                preferred_element_type=jnp.float32) + b1_ref[...]
    h = jnp.maximum(h, 0.0)
    y = jnp.dot(h.astype(jnp.bfloat16), w2_ref[...],
                preferred_element_type=jnp.float32) + b2_ref[...]
    z = x + y
    mean = jnp.mean(z, axis=-1, keepdims=True)
    var = jnp.mean(jnp.square(z - mean), axis=-1, keepdims=True)
    norm = (z - mean) * lax.rsqrt(var + eps)
    out_ref[...] = (norm * g_ref[...] + beta_ref[...]).astype(out_ref.dtype)


def _final_classify_kernel(feat_ref, maskf_ref, wc_ref, bc_ref, out_ref):
    # final_statues = (features * mask_final).sum(1); predictions = classify(...)
    s = jnp.sum(feat_ref[...] * maskf_ref[...], axis=1)        # (B, D)
    y = jnp.dot(s.astype(jnp.bfloat16), wc_ref[...],
                preferred_element_type=jnp.float32) + bc_ref[...]
    out_ref[...] = y.astype(out_ref.dtype)


# ----------------------------------------------------------------------------
# Encoder layer wrapper (MultiHeadAttention + PositionalWiseFeedForward)
# ----------------------------------------------------------------------------
def encoder_layer_forward(x, attn_bias, params, num_heads):
    B, T, D = x.shape
    dph = D // num_heads
    n_rows = B * T
    tm = _row_tile(n_rows)
    f32, bf16 = jnp.float32, jnp.bfloat16

    # torch: scale = (key.size(-1) // num_heads) ** (-0.5) after the head view
    scale = float((dph // num_heads) ** (-0.5))

    # Fused QKV weight: [Wk | Wv | Wq*scale], bias likewise (scale folded into q).
    wqkv = jnp.concatenate(
        [params["wk_t"], params["wv_t"], params["wq_t"] * scale], axis=1).astype(bf16)
    bqkv = jnp.concatenate(
        [params["bk"], params["bv"], params["bq"] * scale], axis=1)     # (1, 3D) f32

    x2 = x.reshape(n_rows, D)

    row_spec = pl.BlockSpec((tm, D), lambda i: (i, 0))
    parallel = pltpu.CompilerParams(dimension_semantics=("parallel",))

    # --- fused Q/K/V projection: one (tm, D) @ (D, 3D) matmul per row tile ---
    k_p, v_p, q_p = pl.pallas_call(
        functools.partial(_qkv_proj_kernel, d_model=D),
        grid=(n_rows // tm,),
        in_specs=[row_spec,
                  pl.BlockSpec((D, 3 * D), lambda i: (0, 0)),   # VMEM-resident
                  pl.BlockSpec((1, 3 * D), lambda i: (0, 0))],
        out_specs=(row_spec, row_spec, row_spec),
        out_shape=(jax.ShapeDtypeStruct((n_rows, D), bf16),
                   jax.ShapeDtypeStruct((n_rows, D), bf16),
                   jax.ShapeDtypeStruct((n_rows, D), bf16)),
        compiler_params=parallel,
    )(x2, wqkv, bqkv)

    # Row-major reshape == torch .view(batch*heads, -1, dim_per_head).
    k_h = k_p.reshape(B * num_heads, T, dph)
    v_h = v_p.reshape(B * num_heads, T, dph)
    q_h = q_p.reshape(B * num_heads, T, dph)

    head_spec = pl.BlockSpec((num_heads, T, dph), lambda b: (b, 0, 0))
    score_spec = pl.BlockSpec((num_heads, T, T), lambda b: (b, 0, 0))

    # --- scaled dot-product attention: all heads of a batch element per step ---
    context, attention = pl.pallas_call(
        _attention_kernel,
        grid=(B,),
        in_specs=[head_spec, head_spec, head_spec, score_spec],
        out_specs=(head_spec, score_spec),
        out_shape=(jax.ShapeDtypeStruct((B * num_heads, T, dph), bf16),
                   jax.ShapeDtypeStruct((B * num_heads, T, T), f32)),
        compiler_params=parallel,
    )(q_h, k_h, v_h, attn_bias)

    # Row-major reshape == torch .view(batch, -1, dim_per_head*num_heads).
    ctx2 = context.reshape(n_rows, D)

    w_spec = pl.BlockSpec((D, D), lambda i: (0, 0))
    vec_spec = pl.BlockSpec((1, D), lambda i: (0, 0))

    # --- final linear + residual + LayerNorm ---
    attn_out = pl.pallas_call(
        functools.partial(_out_ln_kernel, eps=1e-5),
        grid=(n_rows // tm,),
        in_specs=[row_spec, row_spec, w_spec, vec_spec, vec_spec, vec_spec],
        out_specs=row_spec,
        out_shape=jax.ShapeDtypeStruct((n_rows, D), f32),
        compiler_params=parallel,
    )(ctx2, x2, params["wf_t"].astype(bf16), params["bf"],
      params["gamma1"], params["beta1"])

    # --- fused feed-forward + residual + LayerNorm ---
    ffn_dim = params["w1_t"].shape[1]
    out = pl.pallas_call(
        functools.partial(_ffn_kernel, eps=1e-5),
        grid=(n_rows // tm,),
        in_specs=[row_spec,
                  pl.BlockSpec((D, ffn_dim), lambda i: (0, 0)),
                  pl.BlockSpec((1, ffn_dim), lambda i: (0, 0)),
                  pl.BlockSpec((ffn_dim, D), lambda i: (0, 0)),
                  vec_spec, vec_spec, vec_spec],
        out_specs=row_spec,
        out_shape=jax.ShapeDtypeStruct((n_rows, D), f32),
        compiler_params=parallel,
    )(attn_out, params["w1_t"].astype(bf16), params["b1"],
      params["w2_t"].astype(bf16), params["b2"],
      params["gamma2"], params["beta2"])

    return out.reshape(B, T, D), attention


# ----------------------------------------------------------------------------
# Full TransformerFinal forward
# ----------------------------------------------------------------------------
def transformer_final_forward(diagnosis_codes, mask_code, mask_final, lengths,
                              params, num_heads):
    # TODO(synk): units.pad_time / pad_matrix_new preprocessing is external to
    # the module; inputs here arrive already padded.  Embedding gather and
    # positional-index construction are host-side XLA gathers (no clean Pallas
    # win for tiny tables); all dense compute below is Pallas.
    emb = jnp.take(params["emb"], diagnosis_codes, axis=0)          # (B, T, C, D)
    x = (emb * mask_code).sum(axis=2) + params["bias_emb"]          # (B, T, D)

    B, T, D = x.shape
    steps = jnp.arange(1, T + 1, dtype=jnp.int32)[None, :]
    pos = jnp.where(steps <= lengths[:, None], steps, 0)            # input_pos (B, T)
    x = x + jnp.take(params["pos_table"], pos, axis=0)              # + PE lookup

    # padding_mask(ind_pos, ind_pos): True where the key position is padding.
    # torch then does attn_mask.repeat(num_heads,1,1): head-group g uses
    # mask[g % B]; jnp.tile reproduces that exactly.
    key_pad = (pos == 0)                                            # (B, T)
    mask = jnp.broadcast_to(key_pad[:, None, :], (B, T, T))
    mask_rep = jnp.tile(mask, (num_heads, 1, 1))                    # (B*H, T, T)
    attn_bias = jnp.where(mask_rep, jnp.float32(-1e30), jnp.float32(0.0))

    out = x
    attentions = []
    for layer_params in params["layers"]:
        out, attn = encoder_layer_forward(out, attn_bias, layer_params, num_heads)
        attentions.append(attn)

    # --- final masked visit-sum + classifier head ---
    preds = pl.pallas_call(
        _final_classify_kernel,
        grid=(1,),
        in_specs=[pl.BlockSpec((B, T, D), lambda i: (0, 0, 0)),
                  pl.BlockSpec((B, T, 1), lambda i: (0, 0, 0)),
                  pl.BlockSpec((D, 2), lambda i: (0, 0)),
                  pl.BlockSpec((1, 2), lambda i: (0, 0))],
        out_specs=pl.BlockSpec((B, 2), lambda i: (0, 0)),
        out_shape=jax.ShapeDtypeStruct((B, 2), jnp.float32),
    )(out, mask_final, params["wc_t"].astype(jnp.bfloat16), params["bc"])

    return preds, out, attentions


# ----------------------------------------------------------------------------
# Pure-JAX f32 reference (mirrors the PyTorch forward exactly)
# ----------------------------------------------------------------------------
def _layer_norm_ref(x, gamma, beta, eps=1e-5):
    mean = x.mean(-1, keepdims=True)
    var = ((x - mean) ** 2).mean(-1, keepdims=True)
    return (x - mean) / jnp.sqrt(var + eps) * gamma + beta


def _reference_encoder_layer(x, mask_rep, p, num_heads):
    B, T, D = x.shape
    dph = D // num_heads
    k = x @ p["wk_t"] + p["bk"][0]
    v = x @ p["wv_t"] + p["bv"][0]
    q = x @ p["wq_t"] + p["bq"][0]
    k = k.reshape(B * num_heads, T, dph)
    v = v.reshape(B * num_heads, T, dph)
    q = q.reshape(B * num_heads, T, dph)
    scale = (dph // num_heads) ** (-0.5)
    scores = jnp.einsum("bij,bkj->bik", q, k) * scale
    scores = jnp.where(mask_rep, -jnp.inf, scores)
    attn = jax.nn.softmax(scores, axis=-1)
    ctx = jnp.einsum("bik,bkd->bid", attn, v).reshape(B, T, D)
    y = ctx @ p["wf_t"] + p["bf"][0]
    z = _layer_norm_ref(x + y, p["gamma1"][0], p["beta1"][0])
    h = jnp.maximum(z @ p["w1_t"] + p["b1"][0], 0.0)
    y2 = h @ p["w2_t"] + p["b2"][0]
    out = _layer_norm_ref(z + y2, p["gamma2"][0], p["beta2"][0])
    return out, attn


def reference_forward(diagnosis_codes, mask_code, mask_final, lengths, params, num_heads):
    emb = params["emb"][diagnosis_codes]
    x = (emb * mask_code).sum(axis=2) + params["bias_emb"]
    B, T, D = x.shape
    steps = jnp.arange(1, T + 1, dtype=jnp.int32)[None, :]
    pos = jnp.where(steps <= lengths[:, None], steps, 0)
    x = x + params["pos_table"][pos]
    key_pad = (pos == 0)
    mask = jnp.broadcast_to(key_pad[:, None, :], (B, T, T))
    mask_rep = jnp.tile(mask, (num_heads, 1, 1))
    out = x
    attns = []
    for p in params["layers"]:
        out, attn = _reference_encoder_layer(out, mask_rep, p, num_heads)
        attns.append(attn)
    final = (out * mask_final).sum(axis=1)
    preds = final @ params["wc_t"] + params["bc"][0]
    return preds, out, attns


# ----------------------------------------------------------------------------
# Parameter init
# ----------------------------------------------------------------------------
def _pos_encoding_table(max_seq_len, d_model):
    pos = np.arange(max_seq_len)[:, None].astype(np.float64)
    j = np.arange(d_model)[None, :]
    angle = pos / np.power(10000.0, 2.0 * (j // 2) / d_model)
    table = np.zeros((max_seq_len, d_model), np.float32)
    table[:, 0::2] = np.sin(angle[:, 0::2])
    table[:, 1::2] = np.cos(angle[:, 1::2])
    table = np.concatenate([np.zeros((1, d_model), np.float32), table], axis=0)
    return jnp.asarray(table)


def _init_params(key, vocab_size, D, ffn, num_layers, max_seq_len):
    keys = jax.random.split(key, 4 + num_layers)

    def u(k, shape, bound):
        return jax.random.uniform(k, shape, jnp.float32, -bound, bound)

    bd = 1.0 / float(np.sqrt(D))
    bff = 1.0 / float(np.sqrt(ffn))
    params = {
        "emb": u(keys[0], (vocab_size, D), bd),
        "bias_emb": u(keys[1], (D,), 1.0 / float(np.sqrt(vocab_size))),
        "pos_table": _pos_encoding_table(max_seq_len, D),
        "wc_t": u(keys[2], (D, 2), bd),
        "bc": u(keys[3], (1, 2), bd),
        "layers": [],
    }
    for li in range(num_layers):
        lk = jax.random.split(keys[4 + li], 16)
        params["layers"].append({
            # linear weights stored transposed: (in_features, out_features)
            "wk_t": u(lk[0], (D, D), bd), "bk": u(lk[1], (1, D), bd),
            "wv_t": u(lk[2], (D, D), bd), "bv": u(lk[3], (1, D), bd),
            "wq_t": u(lk[4], (D, D), bd), "bq": u(lk[5], (1, D), bd),
            "wf_t": u(lk[6], (D, D), bd), "bf": u(lk[7], (1, D), bd),
            "gamma1": jnp.ones((1, D), jnp.float32),
            "beta1": jnp.zeros((1, D), jnp.float32),
            "w1_t": u(lk[8], (D, ffn), bd), "b1": u(lk[9], (1, ffn), bd),
            "w2_t": u(lk[10], (ffn, D), bff), "b2": u(lk[11], (1, D), bff),
            "gamma2": jnp.ones((1, D), jnp.float32),
            "beta2": jnp.zeros((1, D), jnp.float32),
        })
    return params


# ----------------------------------------------------------------------------
# Main
# ----------------------------------------------------------------------------
if __name__ == "__main__":
    # TransformerFinal defaults: model_dim=256, num_heads=4, ffn_dim=1024, 1 layer.
    B, T, C = 2, 8, 4            # batch, visits (seq len), codes per visit
    D, H, FFN = 256, 4, 1024
    VOCAB = 20
    NUM_LAYERS = 1
    MAX_SEQ_LEN = 51

    root = jax.random.PRNGKey(0)
    kc, km, kp = jax.random.split(root, 3)
    diagnosis_codes = jax.random.randint(kc, (B, T, C), 1, VOCAB + 1)
    mask_code = (jax.random.uniform(km, (B, T, C, 1)) > 0.2).astype(jnp.float32)
    lengths = jnp.array([T, T - 3], dtype=jnp.int32)                 # ragged lengths
    mask_final = (jnp.arange(T)[None, :, None]
                  == (lengths[:, None, None] - 1)).astype(jnp.float32)  # last valid visit

    params = _init_params(kp, VOCAB + 1, D, FFN, NUM_LAYERS, MAX_SEQ_LEN)

    preds, feats, attns = transformer_final_forward(
        diagnosis_codes, mask_code, mask_final, lengths, params, H)
    preds = jax.block_until_ready(preds)
    feats = jax.block_until_ready(feats)
    attns = [jax.block_until_ready(a) for a in attns]

    ref_preds, ref_feats, ref_attns = reference_forward(
        diagnosis_codes, mask_code, mask_final, lengths, params, H)

    assert preds.shape == (B, 2)
    assert feats.shape == (B, T, D)
    assert attns[0].shape == (B * H, T, T)
    # Tolerances account for bf16 MXU inputs (f32 accumulation) + approx reciprocal.
    assert jnp.allclose(attns[0], ref_attns[0], atol=2e-2, rtol=2e-2)
    assert jnp.allclose(feats, ref_feats, atol=5e-2, rtol=5e-2)
    assert jnp.allclose(preds, ref_preds, atol=5e-2, rtol=5e-2)

    print("KERNEL_OK")
</pallas_src>

<mosaic_0001>
module attributes {stable_mosaic.version = 11 : i64} {
  func.func @_qkv_proj_kernel(%arg0: i32, %arg1: memref<16x256xf32, #tpu.memory_space<vmem>>, %arg2: memref<256x768xbf16, #tpu.memory_space<vmem>>, %arg3: memref<1x768xf32, #tpu.memory_space<vmem>>, %arg4: memref<16x256xbf16, #tpu.memory_space<vmem>>, %arg5: memref<16x256xbf16, #tpu.memory_space<vmem>>, %arg6: memref<16x256xbf16, #tpu.memory_space<vmem>>) attributes {dimension_semantics = [#tpu.dimension_semantics<parallel>], iteration_bounds = array<i64: 1>, scalar_prefetch = 0 : i64, scratch_operands = 0 : i64, tpu.core_type = #tpu.core_type<tc>, window_params = [{transform_indices = @transform_0, window_bounds = array<i64: 16, 256>}, {pipeline_mode = #tpu.pipeline_mode<synchronous>, transform_indices = @transform_1, window_bounds = array<i64: 256, 768>}, {pipeline_mode = #tpu.pipeline_mode<synchronous>, transform_indices = @transform_2, window_bounds = array<i64: 1, 768>}, {transform_indices = @transform_3, window_bounds = array<i64: 16, 256>}, {transform_indices = @transform_4, window_bounds = array<i64: 16, 256>}, {transform_indices = @transform_5, window_bounds = array<i64: 16, 256>}]} {
    %c0 = arith.constant 0 : index
    %c0_0 = arith.constant 0 : index
    %0 = vector.load %arg1[%c0, %c0_0] : memref<16x256xf32, #tpu.memory_space<vmem>>, vector<16x256xf32>
    %1 = arith.truncf %0 : vector<16x256xf32> to vector<16x256xbf16>
    %c0_1 = arith.constant 0 : index
    %c0_2 = arith.constant 0 : index
    %2 = vector.load %arg2[%c0_1, %c0_2] : memref<256x768xbf16, #tpu.memory_space<vmem>>, vector<256x768xbf16>
    %cst = arith.constant dense<0.000000e+00> : vector<16x768xf32>
    %3 = tpu.matmul %1, %2, %cst {dimension_numbers = #tpu.dot_dimension_numbers<[1], [0], [0], [1], [0, 0, 1, 1], [], []>} : vector<16x256xbf16>, vector<256x768xbf16>, vector<16x768xf32> -> vector<16x768xf32>
    %c0_3 = arith.constant 0 : index
    %c0_4 = arith.constant 0 : index
    %4 = vector.load %arg3[%c0_3, %c0_4] : memref<1x768xf32, #tpu.memory_space<vmem>>, vector<1x768xf32>
    %5 = vector.broadcast %4 : vector<1x768xf32> to vector<16x768xf32>
    %6 = arith.addf %3, %5 : vector<16x768xf32>
    %7 = vector.extract_strided_slice %6 {offsets = [0, 0], sizes = [16, 256], strides = [1, 1]} : vector<16x768xf32> to vector<16x256xf32>
    %8 = arith.truncf %7 : vector<16x256xf32> to vector<16x256xbf16>
    %c0_5 = arith.constant 0 : index
    %c0_6 = arith.constant 0 : index
    %9 = vector.load %arg4[%c0_5, %c0_6] : memref<16x256xbf16, #tpu.memory_space<vmem>>, vector<16x256xbf16>
    tpu.vector_store %arg4[%c0_5, %c0_6], %8 {strides = array<i32>} : memref<16x256xbf16, #tpu.memory_space<vmem>>, vector<16x256xbf16>,
    %10 = vector.extract_strided_slice %6 {offsets = [0, 256], sizes = [16, 256], strides = [1, 1]} : vector<16x768xf32> to vector<16x256xf32>
    %11 = arith.truncf %10 : vector<16x256xf32> to vector<16x256xbf16>
    %c0_7 = arith.constant 0 : index
    %c0_8 = arith.constant 0 : index
    %12 = vector.load %arg5[%c0_7, %c0_8] : memref<16x256xbf16, #tpu.memory_space<vmem>>, vector<16x256xbf16>
    tpu.vector_store %arg5[%c0_7, %c0_8], %11 {strides = array<i32>} : memref<16x256xbf16, #tpu.memory_space<vmem>>, vector<16x256xbf16>,
    %13 = vector.extract_strided_slice %6 {offsets = [0, 512], sizes = [16, 256], strides = [1, 1]} : vector<16x768xf32> to vector<16x256xf32>
    %14 = arith.truncf %13 : vector<16x256xf32> to vector<16x256xbf16>
    %c0_9 = arith.constant 0 : index
    %c0_10 = arith.constant 0 : index
    %15 = vector.load %arg6[%c0_9, %c0_10] : memref<16x256xbf16, #tpu.memory_space<vmem>>, vector<16x256xbf16>
    tpu.vector_store %arg6[%c0_9, %c0_10], %14 {strides = array<i32>} : memref<16x256xbf16, #tpu.memory_space<vmem>>, vector<16x256xbf16>,
    return
  }
  func.func @transform_0(%arg0: i32) -> (i32, i32) {
    %c0_i32 = arith.constant 0 : i32
    %c0_i32_0 = arith.constant 0 : i32
    return %arg0, %c0_i32 : i32, i32
  }
  func.func @transform_1(%arg0: i32) -> (i32, i32) {
    %c0_i32 = arith.constant 0 : i32
    %c0_i32_0 = arith.constant 0 : i32
    %c0_i32_1 = arith.constant 0 : i32
    return %c0_i32, %c0_i32_0 : i32, i32
  }
  func.func @transform_2(%arg0: i32) -> (i32, i32) {
    %c0_i32 = arith.constant 0 : i32
    %c0_i32_0 = arith.constant 0 : i32
    %c0_i32_1 = arith.constant 0 : i32
    return %c0_i32, %c0_i32_0 : i32, i32
  }
  func.func @transform_3(%arg0: i32) -> (i32, i32) {
    %c0_i32 = arith.constant 0 : i32
    %c0_i32_0 = arith.constant 0 : i32
    return %arg0, %c0_i32 : i32, i32
  }
  func.func @transform_4(%arg0: i32) -> (i32, i32) {
    %c0_i32 = arith.constant 0 : i32
    %c0_i32_0 = arith.constant 0 : i32
    return %arg0, %c0_i32 : i32, i32
  }
  func.func @transform_5(%arg0: i32) -> (i32, i32) {
    %c0_i32 = arith.constant 0 : i32
    %c0_i32_0 = arith.constant 0 : i32
    return %arg0, %c0_i32 : i32, i32
  }
}

</mosaic_0001>

<bundles_post_ra>
// kernel: tpu_custom_call.1
= control target key start
LH: loop header
LB: loop body
LE: loop exit
PB: predicated region body
PF: predicated region fallthrough
CT: control target
= control target key end

     0   :  { %11 = vsyncpa [#allocation3], 0  ;;  %s1371_s0 = inlined_call_operand.hbm [shape: f32[16,256], index: 0, kind: input, shape index: {}]   ;;  %s1372_s1 = inlined_call_operand.hbm [shape: bf16[256,768], index: 1, kind: input, shape index: {}]   ;;  %s1373_s2 = inlined_call_operand.hbm [shape: f32[1,768], index: 2, kind: input, shape index: {}]   ;;  %s1374_s3 = inlined_call_operand.hbm [shape: bf16[16,256], index: 3, kind: output, shape index: {0}]   ;;  %s1375_s4 = inlined_call_operand.hbm [shape: bf16[16,256], index: 4, kind: output, shape index: {1}]   ;;  %s1376_s5 = inlined_call_operand.hbm [shape: bf16[16,256], index: 5, kind: output, shape index: {2}]  }
   0x1   :  { %12 = vsyncpa [#allocation6], 0 }
   0x2   :  { %13 = vsyncpa [#allocation4], 0 }
   0x3   :  { %14 = vsyncpa [#allocation10], 0  ;;  %s1284_s18 = smov [#allocation5]  }
   0x4   :  { %s32_s19 = sshll.u32 %s1284_s18, 4  ;;  %s33_s19 = int_to_ptr.vmem [resolvable:$true] %s32_s19 }
   0x5   :  { %s1164_s20 = scalar_lea.vmem %s33_s19, 12288  ;;  %p1169_p1 = scmp.lt.s32.totalorder %s33_s19, %s33_s19 }
   0x6   :  { %p1165_p0 = scmp.ne.s32.totalorder %s33_s19, %s1164_s20  ;;  %p1170_p2 = scmp.lt.s32.totalorder %s1164_s20, %s1164_s20 }
   0x8   :  { %p1171_p3 = por %p1170_p2, %p1169_p1 }
   0xa   :  { %p1172_p4 = pnand %p1171_p3, %p1165_p0 }
   0xc   :  { %1175 = shalt.err (!%p1172_p4)
}
   0xd   :  { %s1285_s21 = smov 384   ;;  %s1286_s22 = smov 24  }
   0xe   :  { %38 = dma.hbm_to_vmem [thread:$0]  %s1372_s1, 12288, %s33_s19, [#allocation6], %s1285_s21, %s1285_s21, %s1286_s22  }
   0xf   :  { %s1287_s25 = smov [#allocation2]  }
  0x10   :  { %s20_s26 = sshll.u32 %s1287_s25, 4  ;;  %s21_s26 = int_to_ptr.vmem [resolvable:$true] %s20_s26 }
  0x11   :  { %s1184_s27 = scalar_lea.vmem %s21_s26, 512  ;;  %p1189_p6 = scmp.lt.s32.totalorder %s21_s26, %s21_s26 }
  0x12   :  { %p1185_p5 = scmp.ne.s32.totalorder %s21_s26, %s1184_s27  ;;  %p1190_p7 = scmp.lt.s32.totalorder %s1184_s27, %s1184_s27 }
  0x14   :  { %p1191_p8 = por %p1190_p7, %p1189_p6 }
  0x16   :  { %p1192_p9 = pnand %p1191_p8, %p1185_p5 }
  0x18   :  { %1195 = shalt.err (!%p1192_p9)
}
  0x19   :  { %s1288_s28 = smov 256   ;;  %s1289_s29 = smov 16  }
  0x1a   :  { %26 = dma.hbm_to_vmem [thread:$0]  %s1371_s0, 512, %s21_s26, [#allocation3], %s1288_s28, %s1288_s28, %s1289_s29  }
  0x1b   :  { %s1290_s7 = smov [#allocation7]  }
  0x1c   :  { %s45_s8 = sshll.u32 %s1290_s7, 4  ;;  %s46_s8 = int_to_ptr.vmem [resolvable:$true] %s45_s8 }
  0x1d   :  { %s1204_s1 = scalar_lea.vmem %s46_s8, 96  ;;  %p1209_p11 = scmp.lt.s32.totalorder %s46_s8, %s46_s8 }
  0x1e   :  { %p1205_p10 = scmp.ne.s32.totalorder %s46_s8, %s1204_s1  ;;  %p1210_p12 = scmp.lt.s32.totalorder %s1204_s1, %s1204_s1 }
  0x20   :  { %p1211_p13 = por %p1210_p12, %p1209_p11 }
  0x22   :  { %p1212_p0 = pnand %p1211_p13, %p1205_p10 }
  0x24   :  { %1215 = shalt.err (!%p1212_p0)
}
  0x25   :  { %48 = dma.hbm_to_vmem [thread:$0]  %s1373_s2, 96, %s46_s8, [#allocation6]  }
  0x26   :  { %1276 = dma.done.wait [#allocation3], 512  }
  0x27   :  { %1277 = vsyncadd [#allocation3], 4294966784 }
  0x28   :  { %1278 = dma.done.wait [#allocation6], 12384  }
  0x29   :  { %1279 = vsyncadd [#allocation6], 4294954912  ;;  %v1012_v0 = vld [vmem:[#allocation5 + $0x154] ss:$24 sps:$4 sm:$0xff]   ;;  %v1014_v1 = vld [vmem:[#allocation5 + $0x150] ss:$24 sps:$4 sm:$0xff]  }
  0x2a   :  { %672 = vmatprep.subr.bf16.mxu0 %v1012_v0  ;;  %v1015_v2 = vld [vmem:[#allocation5 + $0x124] ss:$24 sps:$4 sm:$0xff]   ;;  %v1017_v3 = vld [vmem:[#allocation5 + $0x120] ss:$24 sps:$4 sm:$0xff]   ;;  %v1018_v4 = vld [vmem:[#allocation5 + $0xf4] ss:$24 sps:$4 sm:$0xff]  }
  0x2b   :  { %673 = vmatpush1.bf16.msra.mxu0 %v1014_v1  ;;  %v1020_v5 = vld [vmem:[#allocation5 + $0xf0] ss:$24 sps:$4 sm:$0xff]   ;;  %v1021_v6 = vld [vmem:[#allocation5 + $0xc4] ss:$24 sps:$4 sm:$0xff]   ;;  %v1023_v7 = vld [vmem:[#allocation5 + $0xc0] ss:$24 sps:$4 sm:$0xff]  }
  0x2c   :  { %674 = vmatprep.subr.bf16.mxu0 %v1015_v2  ;;  %v1024_v8 = vld [vmem:[#allocation5 + $0x94] ss:$24 sps:$4 sm:$0xff]   ;;  %v1026_v9 = vld [vmem:[#allocation5 + $0x90] ss:$24 sps:$4 sm:$0xff]   ;;  %v1027_v10 = vld [vmem:[#allocation5 + $0x64] ss:$24 sps:$4 sm:$0xff]  }
  0x2d   :  { %v1029_v11 = vld [vmem:[#allocation5 + $0x60] ss:$24 sps:$4 sm:$0xff]   ;;  %v1030_v12 = vld [vmem:[#allocation5 + $0x34] ss:$24 sps:$4 sm:$0xff]   ;;  %v1032_v15 = vld [vmem:[#allocation5 + $0x30] ss:$24 sps:$4 sm:$0xff]  }
  0x2e   :  { %v1057_v13 = vld [vmem:[#allocation5 + $0x15c] ss:$24 sps:$4 sm:$0xff]   ;;  %v1059_v14 = vld [vmem:[#allocation5 + $0x158] ss:$24 sps:$4 sm:$0xff]   ;;  %v1063_v16 = vld [vmem:[#allocation5 + $0x12c] ss:$24 sps:$4 sm:$0xff]  }
  0x2f   :  { %675 = vmatpush1.bf16.msra.mxu0 %v1017_v3  ;;  %715 = vmatprep.subr.bf16.mxu1 %v1057_v13  ;;  %v1065_v17 = vld [vmem:[#allocation5 + $0x128] ss:$24 sps:$4 sm:$0xff]   ;;  %v1033_v18 = vld [vmem:[#allocation5 + $0x4] ss:$24 sps:$4 sm:$0xff]   ;;  %v1071_v24 = vld [vmem:[#allocation5 + $0xf8] ss:$24 sps:$4 sm:$0xff]  }
  0x30   :  { %676 = vmatprep.subr.bf16.mxu0 %v1018_v4  ;;  %716 = vmatpush1.bf16.msra.mxu1 %v1059_v14  ;;  %v59_v19 = vld [vmem:[#allocation2 + $0x8] sm:$0xff]  ;;  %v61_v20 = vld [vmem:[#allocation2 + $0x18] sm:$0xff]  ;;  %v58_v56 = vld [vmem:[#allocation2] sm:$0xff]  ;;  %s1291_s0 = smov [#allocation8]  }
  0x31   :  { %717 = vmatprep.subr.bf16.mxu1 %v1063_v16  ;;  %v1335_v21 = vpack.c.bf16 %v61_v20, %v59_v19  ;;  %v1035_v22 = vld [vmem:[#allocation5] ss:$24 sps:$4 sm:$0xff]   ;;  %v1069_v23 = vld [vmem:[#allocation5 + $0xfc] ss:$24 sps:$4 sm:$0xff]   ;;  %v1038_v26 = vld [vmem:[#allocation5 + $0x2d0] ss:$24 sps:$4 sm:$0xff]  }
  0x32   :  { %v1036_v25 = vld [vmem:[#allocation5 + $0x2d4] ss:$24 sps:$4 sm:$0xff]   ;;  %v1039_v28 = vld [vmem:[#allocation5 + $0x2a4] ss:$24 sps:$4 sm:$0xff]   ;;  %v1077_v29 = vld [vmem:[#allocation5 + $0xc8] ss:$24 sps:$4 sm:$0xff]  }
  0x33   :  { %677 = vmatpush1.bf16.msra.mxu0 %v1020_v5  ;;  %704 = vmatprep.mubr.bf16.mxu0 %v1335_v21  ;;  %v1075_v27 = vld [vmem:[#allocation5 + $0xcc] ss:$24 sps:$4 sm:$0xff]   ;;  %v1081_v30 = vld [vmem:[#allocation5 + $0x9c] ss:$24 sps:$4 sm:$0xff]   ;;  %v1041_v31 = vld [vmem:[#allocation5 + $0x2a0] ss:$24 sps:$4 sm:$0xff]  }
  0x34   :  { %678 = vmatprep.subr.bf16.mxu0 %v1021_v6  ;;  %718 = vmatpush1.bf16.msra.mxu1 %v1065_v17  ;;  %v1042_v32 = vld [vmem:[#allocation5 + $0x274] ss:$24 sps:$4 sm:$0xff]   ;;  %v1083_v33 = vld [vmem:[#allocation5 + $0x98] ss:$24 sps:$4 sm:$0xff]   ;;  %v1045_v36 = vld [vmem:[#allocation5 + $0x244] ss:$24 sps:$4 sm:$0xff]  }
  0x35   :  { %719 = vmatprep.subr.bf16.mxu1 %v1069_v23  ;;  %747 = vmatprep.mubr.bf16.mxu1 %v1335_v21  ;;  %v1087_v34 = vld [vmem:[#allocation5 + $0x6c] ss:$24 sps:$4 sm:$0xff]   ;;  %v1044_v35 = vld [vmem:[#allocation5 + $0x270] ss:$24 sps:$4 sm:$0xff]   ;;  %v1093_v38 = vld [vmem:[#allocation5 + $0x3c] ss:$24 sps:$4 sm:$0xff]  }
  0x36   :  { %v1089_v37 = vld [vmem:[#allocation5 + $0x68] ss:$24 sps:$4 sm:$0xff]   ;;  %v1048_v40 = vld [vmem:[#allocation5 + $0x214] ss:$24 sps:$4 sm:$0xff]   ;;  %v1095_v41 = vld [vmem:[#allocation5 + $0x38] ss:$24 sps:$4 sm:$0xff]  }
  0x37   :  { %679 = vmatpush1.bf16.msra.mxu0 %v1023_v7  ;;  %v1047_v39 = vld [vmem:[#allocation5 + $0x240] ss:$24 sps:$4 sm:$0xff]   ;;  %v1099_v42 = vld [vmem:[#allocation5 + $0xc] ss:$24 sps:$4 sm:$0xff]   ;;  %v1050_v43 = vld [vmem:[#allocation5 + $0x210] ss:$24 sps:$4 sm:$0xff]  }
  0x38   :  { %680 = vmatprep.subr.bf16.mxu0 %v1024_v8  ;;  %720 = vmatpush1.bf16.msra.mxu1 %v1071_v24  ;;  %v1051_v44 = vld [vmem:[#allocation5 + $0x1e4] ss:$24 sps:$4 sm:$0xff]   ;;  %v1101_v45 = vld [vmem:[#allocation5 + $0x8] ss:$24 sps:$4 sm:$0xff]   ;;  %v1054_v48 = vld [vmem:[#allocation5 + $0x1b4] ss:$24 sps:$4 sm:$0xff]  }
  0x39   :  { %721 = vmatprep.subr.bf16.mxu1 %v1075_v27  ;;  %v1105_v46 = vld [vmem:[#allocation5 + $0x2dc] ss:$24 sps:$4 sm:$0xff]   ;;  %v1053_v47 = vld [vmem:[#allocation5 + $0x1e0] ss:$24 sps:$4 sm:$0xff]   ;;  %v1111_v50 = vld [vmem:[#allocation5 + $0x2ac] ss:$24 sps:$4 sm:$0xff]  }
  0x3a   :  { %v1107_v49 = vld [vmem:[#allocation5 + $0x2d8] ss:$24 sps:$4 sm:$0xff]   ;;  %v1060_v52 = vld [vmem:[#allocation5 + $0x184] ss:$24 sps:$4 sm:$0xff]   ;;  %v1113_v53 = vld [vmem:[#allocation5 + $0x2a8] ss:$24 sps:$4 sm:$0xff]  }
  0x3b   :  { %681 = vmatpush1.bf16.msra.mxu0 %v1026_v9  ;;  %v1056_v51 = vld [vmem:[#allocation5 + $0x1b0] ss:$24 sps:$4 sm:$0xff]   ;;  %v1117_v54 = vld [vmem:[#allocation5 + $0x27c] ss:$24 sps:$4 sm:$0xff]   ;;  %v1062_v55 = vld [vmem:[#allocation5 + $0x180] ss:$24 sps:$4 sm:$0xff]  }
  0x3c   :  { %682 = vmatprep.subr.bf16.mxu0 %v1027_v10  ;;  %722 = vmatpush1.bf16.msra.mxu1 %v1077_v29  ;;  %v60_v57 = vld [vmem:[#allocation2 + $0x10] sm:$0xff]  ;;  %v1068_v58 = vld [vmem:[#allocation5 + $0x164] ss:$24 sps:$4 sm:$0xff]   ;;  %v1066_v62 = vld [vmem:[#allocation5 + $0x160] ss:$24 sps:$4 sm:$0xff]   ;;  %s848_s2 = sshll.u32 %s1291_s0, 4  ;;  %s849_s2 = int_to_ptr.vmem [resolvable:$true] %s848_s2 }
  0x3d   :  { %723 = vmatprep.subr.bf16.mxu1 %v1081_v30  ;;  %v1119_v59 = vld [vmem:[#allocation5 + $0x278] ss:$24 sps:$4 sm:$0xff]   ;;  %v1123_v60 = vld [vmem:[#allocation5 + $0x24c] ss:$24 sps:$4 sm:$0xff]   ;;  %v1339_v61 = vpack.c.bf16 %v60_v57, %v58_v56  ;;  %v1125_v0 = vld [vmem:[#allocation5 + $0x248] ss:$24 sps:$4 sm:$0xff]   ;;  %p1221_p2 = scmp.lt.s32.totalorder %s849_s2, %s849_s2 }
  0x3e   :  { %v1074_v63 = vld [vmem:[#allocation5 + $0x134] ss:$24 sps:$4 sm:$0xff]   ;;  %v1072_v2 = vld [vmem:[#allocation5 + $0x130] ss:$24 sps:$4 sm:$0xff]   ;;  %v1080_v4 = vld [vmem:[#allocation5 + $0x104] ss:$24 sps:$4 sm:$0xff]  }
  0x3f   :  { %683 = vmatpush1.bf16.msra.mxu0 %v1029_v11  ;;  %v1129_v1 = vld [vmem:[#allocation5 + $0x21c] ss:$24 sps:$4 sm:$0xff]   ;;  %v1131_v3 = vld [vmem:[#allocation5 + $0x218] ss:$24 sps:$4 sm:$0xff]   ;;  %v1135_v5 = vld [vmem:[#allocation5 + $0x1ec] ss:$24 sps:$4 sm:$0xff]  }
  0x40   :  { %684 = vmatprep.subr.bf16.mxu0 %v1030_v12  ;;  %724 = vmatpush1.bf16.msra.mxu1 %v1083_v33  ;;  %v1078_v6 = vld [vmem:[#allocation5 + $0x100] ss:$24 sps:$4 sm:$0xff]   ;;  %v1086_v8 = vld [vmem:[#allocation5 + $0xd4] ss:$24 sps:$4 sm:$0xff]   ;;  %v1084_v10 = vld [vmem:[#allocation5 + $0xd0] ss:$24 sps:$4 sm:$0xff]  }
  0x41   :  { %725 = vmatprep.subr.bf16.mxu1 %v1087_v34  ;;  %v1137_v7 = vld [vmem:[#allocation5 + $0x1e8] ss:$24 sps:$4 sm:$0xff]   ;;  %v1141_v9 = vld [vmem:[#allocation5 + $0x1bc] ss:$24 sps:$4 sm:$0xff]   ;;  %v1143_v11 = vld [vmem:[#allocation5 + $0x1b8] ss:$24 sps:$4 sm:$0xff]  }
  0x42   :  { %v1092_v12 = vld [vmem:[#allocation5 + $0xa4] ss:$24 sps:$4 sm:$0xff]   ;;  %v1090_v14 = vld [vmem:[#allocation5 + $0xa0] ss:$24 sps:$4 sm:$0xff]   ;;  %v1098_v16 = vld [vmem:[#allocation5 + $0x74] ss:$24 sps:$4 sm:$0xff]  }
  0x43   :  { %685 = vmatpush1.bf16.msra.mxu0 %v1032_v15  ;;  %v1147_v13 = vld [vmem:[#allocation5 + $0x18c] ss:$24 sps:$4 sm:$0xff]   ;;  %v1149_v15 = vld [vmem:[#allocation5 + $0x188] ss:$24 sps:$4 sm:$0xff]   ;;  %s1216_s11 = scalar_lea.vmem %s849_s2, 256 }
  0x44   :  { %686 = vmatprep.subr.bf16.mxu0 %v1033_v18  ;;  %726 = vmatpush1.bf16.msra.mxu1 %v1089_v37  ;;  %v1096_v17 = vld [vmem:[#allocation5 + $0x70] ss:$24 sps:$4 sm:$0xff]   ;;  %v1104_v18 = vld [vmem:[#allocation5 + $0x44] ss:$24 sps:$4 sm:$0xff]   ;;  %v1102_v19 = vld [vmem:[#allocation5 + $0x40] ss:$24 sps:$4 sm:$0xff]   ;;  %p1217_p1 = scmp.ne.s32.totalorder %s849_s2, %s1216_s11  ;;  %p1222_p3 = scmp.lt.s32.totalorder %s1216_s11, %s1216_s11 }
  0x45   :  { %727 = vmatprep.subr.bf16.mxu1 %v1093_v38  ;;  %v1110_v20 = vld [vmem:[#allocation5 + $0x14] ss:$24 sps:$4 sm:$0xff]   ;;  %v1114_v23 = vld [vmem:[#allocation5 + $0x2e0] ss:$24 sps:$4 sm:$0xff]   ;;  %v1132_v29 = vld [vmem:[#allocation5 + $0x250] ss:$24 sps:$4 sm:$0xff]   ;;  %v162_v38 = vlaneseq }
  0x46   :  { %v1122_v24 = vld [vmem:[#allocation5 + $0x2b4] ss:$24 sps:$4 sm:$0xff]   ;;  %v1126_v27 = vld [vmem:[#allocation5 + $0x280] ss:$24 sps:$4 sm:$0xff]   ;;  %v1140_v30 = vld [vmem:[#allocation5 + $0x224] ss:$24 sps:$4 sm:$0xff]   ;;  %p1223_p4 = por %p1222_p3, %p1221_p2 }
  0x47   :  { %687 = vmatpush1.bf16.msra.mxu0 %v1035_v22  ;;  %v1116_v22 = vld [vmem:[#allocation5 + $0x2e4] ss:$24 sps:$4 sm:$0xff]   ;;  %v1144_v33 = vld [vmem:[#allocation5 + $0x1f0] ss:$24 sps:$4 sm:$0xff]  }
  0x48   :  { %688 = vmatprep.subr.bf16.mxu0 %v1036_v25  ;;  %728 = vmatpush1.bf16.msra.mxu1 %v1095_v41  ;;  %v1120_v25 = vld [vmem:[#allocation5 + $0x2b0] ss:$24 sps:$4 sm:$0xff]   ;;  %v1152_v34 = vld [vmem:[#allocation5 + $0x1c4] ss:$24 sps:$4 sm:$0xff]   ;;  %p1224_p5 = pnand %p1223_p4, %p1217_p1 }
  0x49   :  { %729 = vmatprep.subr.bf16.mxu1 %v1099_v42  ;;  %v1153_v37 = vld [vmem:[#allocation5 + $0x190] ss:$24 sps:$4 sm:$0xff]   ;;  %v160_v41 = vld [vmem:[#allocation7] sm:$0x3f] }
  0x4b   :  { %689 = vmatpush2.bf16.msra.mxu0 %v1038_v26  ;;  %v1128_v26 = vld [vmem:[#allocation5 + $0x284] ss:$24 sps:$4 sm:$0xff]  }
  0x4c   :  { %690 = vmatprep.subr.bf16.mxu0 %v1039_v28  ;;  %730 = vmatpush1.bf16.msra.mxu1 %v1101_v45  ;;  %v1134_v28 = vld [vmem:[#allocation5 + $0x254] ss:$24 sps:$4 sm:$0xff]  }
  0x4d   :  { %731 = vmatprep.subr.bf16.mxu1 %v1105_v46 }
  0x4f   :  { %691 = vmatpush2.bf16.msra.mxu0 %v1041_v31  ;;  %v1138_v31 = vld [vmem:[#allocation5 + $0x220] ss:$24 sps:$4 sm:$0xff]  }
  0x50   :  { %692 = vmatprep.subr.bf16.mxu0 %v1042_v32  ;;  %732 = vmatpush2.bf16.msra.mxu1 %v1107_v49  ;;  %v1146_v32 = vld [vmem:[#allocation5 + $0x1f4] ss:$24 sps:$4 sm:$0xff]  }
  0x51   :  { %733 = vmatprep.subr.bf16.mxu1 %v1111_v50 }
  0x53   :  { %693 = vmatpush2.bf16.msra.mxu0 %v1044_v35  ;;  %v1150_v35 = vld [vmem:[#allocation5 + $0x1c0] ss:$24 sps:$4 sm:$0xff]  }
  0x54   :  { %694 = vmatprep.subr.bf16.mxu0 %v1045_v36  ;;  %734 = vmatpush2.bf16.msra.mxu1 %v1113_v53  ;;  %v1155_v36 = vld [vmem:[#allocation5 + $0x194] ss:$24 sps:$4 sm:$0xff]  }
  0x55   :  { %735 = vmatprep.subr.bf16.mxu1 %v1117_v54 }
  0x57   :  { %695 = vmatpush2.bf16.msra.mxu0 %v1047_v39  ;;  %v163_v39 = vshrl.u32 %v162_v38, 7 }
  0x58   :  { %696 = vmatprep.subr.bf16.mxu0 %v1048_v40  ;;  %736 = vmatpush2.bf16.msra.mxu1 %v1119_v59 }
  0x59   :  { %737 = vmatprep.subr.bf16.mxu1 %v1123_v60  ;;  %v180_v40 = vsub.s32 4, %v163_v39  ;;  %v164_v45 = vsub.s32 0, %v163_v39  ;;  %v168_v46 = vsub.s32 1, %v163_v39 }
  0x5b   :  { %697 = vmatpush2.bf16.msra.mxu0 %v1050_v43  ;;  %v1345_v42 = vrot.slane %v160_v41, %v180_v40  ;;  %v184_v43 = vsub.s32 5, %v163_v39 }
  0x5c   :  { %698 = vmatprep.subr.bf16.mxu0 %v1051_v44  ;;  %738 = vmatpush2.bf16.msra.mxu1 %v1125_v0 }
  0x5d   :  { %739 = vmatprep.subr.bf16.mxu1 %v1129_v1  ;;  %v1347_v44 = vrot.slane %v160_v41, %v184_v43 }
  0x5f   :  { %699 = vmatpush2.bf16.msra.mxu0 %v1053_v47  ;;  %v165_v47 = vrot.slane %v160_v41, %v164_v45 }
  0x60   :  { %700 = vmatprep.subr.bf16.mxu0 %v1054_v48  ;;  %740 = vmatpush2.bf16.msra.mxu1 %v1131_v3  ;;  %v169_v48 = vrot.slane %v160_v41, %v168_v46 }
  0x61   :  { %741 = vmatprep.subr.bf16.mxu1 %v1135_v5 }
  0x63   :  { %701 = vmatpush2.bf16.msra.mxu0 %v1056_v51 }
  0x64   :  { %702 = vmatprep.subr.bf16.mxu0 %v1060_v52  ;;  %742 = vmatpush2.bf16.msra.mxu1 %v1137_v7 }
  0x65   :  { %743 = vmatprep.subr.bf16.mxu1 %v1141_v9 }
  0x67   :  { %703 = vmatpush2.bf16.msra.mxu0 %v1062_v55 }
  0x68   :  { %758 = vmatprep.subr.bf16.mxu0 %v1068_v58  ;;  %744 = vmatpush2.bf16.msra.mxu1 %v1143_v11 }
  0x69   :  { %745 = vmatprep.subr.bf16.mxu1 %v1147_v13 }
  0x6a   :  { %705 = vmatmul.mubr.bf16.vlgmr.msra.gmra.mxu0 %v1339_v61 }
  0x6b   :  { %759 = vmatpush1.bf16.msra.mxu0 %v1066_v62  ;;  %790 = vmatprep.mubr.bf16.mxu0 %v1335_v21  ;;  %v1108_v21 = vld [vmem:[#allocation5 + $0x10] ss:$24 sps:$4 sm:$0xff]  }
  0x6c   :  { %760 = vmatprep.subr.bf16.mxu0 %v1074_v63  ;;  %746 = vmatpush2.bf16.msra.mxu1 %v1149_v15 }
  0x6f   :  { %761 = vmatpush1.bf16.msra.mxu0 %v1072_v2  ;;  %748 = vmatmul.mubr.bf16.vlgmr.msra.gmra.mxu1 %v1339_v61 }
  0x70   :  { %762 = vmatprep.subr.bf16.mxu0 %v1080_v4 }
  0x73   :  { %763 = vmatpush1.bf16.msra.mxu0 %v1078_v6 }
  0x74   :  { %764 = vmatprep.subr.bf16.mxu0 %v1086_v8 }
  0x77   :  { %765 = vmatpush1.bf16.msra.mxu0 %v1084_v10 }
  0x78   :  { %766 = vmatprep.subr.bf16.mxu0 %v1092_v12 }
  0x7b   :  { %767 = vmatpush1.bf16.msra.mxu0 %v1090_v14 }
  0x7c   :  { %768 = vmatprep.subr.bf16.mxu0 %v1098_v16 }
  0x7f   :  { %769 = vmatpush1.bf16.msra.mxu0 %v1096_v17 }
  0x80   :  { %770 = vmatprep.subr.bf16.mxu0 %v1104_v18 }
  0x83   :  { %771 = vmatpush1.bf16.msra.mxu0 %v1102_v19 }
  0x84   :  { %772 = vmatprep.subr.bf16.mxu0 %v1110_v20 }
  0x87   :  { %773 = vmatpush1.bf16.msra.mxu0 %v1108_v21 }
  0x88   :  { %774 = vmatprep.subr.bf16.mxu0 %v1116_v22 }
  0x8b   :  { %775 = vmatpush2.bf16.msra.mxu0 %v1114_v23 }
  0x8c   :  { %776 = vmatprep.subr.bf16.mxu0 %v1122_v24 }
  0x8f   :  { %777 = vmatpush2.bf16.msra.mxu0 %v1120_v25 }
  0x90   :  { %778 = vmatprep.subr.bf16.mxu0 %v1128_v26 }
  0x93   :  { %779 = vmatpush2.bf16.msra.mxu0 %v1126_v27 }
  0x94   :  { %780 = vmatprep.subr.bf16.mxu0 %v1134_v28 }
  0x97   :  { %781 = vmatpush2.bf16.msra.mxu0 %v1132_v29 }
  0x98   :  { %782 = vmatprep.subr.bf16.mxu0 %v1140_v30 }
  0x9b   :  { %783 = vmatpush2.bf16.msra.mxu0 %v1138_v31 }
  0x9c   :  { %784 = vmatprep.subr.bf16.mxu0 %v1146_v32 }
  0x9f   :  { %785 = vmatpush2.bf16.msra.mxu0 %v1144_v33 }
  0xa0   :  { %786 = vmatprep.subr.bf16.mxu0 %v1152_v34 }
  0xa3   :  { %787 = vmatpush2.bf16.msra.mxu0 %v1150_v35 }
  0xa4   :  { %788 = vmatprep.subr.bf16.mxu0 %v1155_v36 }
  0xa7   :  { %789 = vmatpush2.bf16.msra.mxu0 %v1153_v37 }
  0xaa   :  { %791 = vmatmul.mubr.bf16.vlgmr.msra.gmra.mxu0 %v1339_v61 }
 0x12a   :  { %v706_v49 = vpop.f32.mrf.mxu0 }
 0x12b   :  { %v707_v50 = vadd.f32 %v706_v49, %v165_v47 }
 0x12c   :  { %v708_v51 = vpop.f32.mrf.mxu0 }
 0x12d   :  { %v709_v52 = vadd.f32 %v708_v51, %v169_v48 }
 0x12e   :  { %v710_v53 = vpop.f32.mrf.mxu0 }
 0x12f   :  { %v994_v54 = vpack.c.bf16 %v709_v52, %v707_v50  ;;  %v711_v56 = vadd.f32 %v710_v53, %v165_v47 }
 0x130   :  { %v712_v55 = vpop.f32.mrf.mxu0 }
 0x131   :  { %813 = vst [vmem:[#allocation8] sm:$0xff] %v994_v54  ;;  %v713_v57 = vadd.f32 %v712_v55, %v169_v48 }
 0x133   :  { %v995_v58 = vpack.c.bf16 %v713_v57, %v711_v56 }
 0x135   :  { %814 = vst [vmem:[#allocation8 + $0x8] sm:$0xff] %v995_v58 }
 0x136   :  { %1227 = shalt.err (!%p1224_p5)
}
 0x137   :  { %s1292_s12 = smov 128   ;;  %s1293_s13 = smov 8   ;;  %v172_v59 = vsub.s32 2, %v163_v39  ;;  %v176_v60 = vsub.s32 3, %v163_v39  ;;  %v749_v63 = vpop.f32.mrf.mxu1 }
 0x138   :  { %854 = dma.vmem_to_hbm [thread:$0]  %s849_s2, 256, %s1374_s3, [#allocation4], %s1292_s12, %s1292_s12, %s1293_s13  }
 0x139   :  { %v173_v61 = vrot.slane %v160_v41, %v172_v59  ;;  %v177_v62 = vrot.slane %v160_v41, %v176_v60  ;;  %v751_v1 = vpop.f32.mrf.mxu1  ;;  %s1294_s16 = smov [#allocation9]  }
 0x13a   :  { %s860_s17 = sshll.u32 %s1294_s16, 4  ;;  %s861_s17 = int_to_ptr.vmem [resolvable:$true] %s860_s17 }
 0x13b   :  { %v750_v0 = vadd.f32 %v749_v63, %v173_v61  ;;  %v752_v2 = vadd.f32 %v751_v1, %v177_v62  ;;  %v753_v3 = vpop.f32.mrf.mxu1  ;;  %s1236_s3 = scalar_lea.vmem %s861_s17, 256  ;;  %p1241_p7 = scmp.lt.s32.totalorder %s861_s17, %s861_s17 }
 0x13c   :  { %v754_v5 = vadd.f32 %v753_v3, %v173_v61  ;;  %p1237_p6 = scmp.ne.s32.totalorder %s861_s17, %s1236_s3  ;;  %p1242_p8 = scmp.lt.s32.totalorder %s1236_s3, %s1236_s3 }
 0x13d   :  { %v996_v4 = vpack.c.bf16 %v752_v2, %v750_v0  ;;  %v755_v6 = vpop.f32.mrf.mxu1 }
 0x13e   :  { %v756_v7 = vadd.f32 %v755_v6, %v177_v62  ;;  %p1243_p9 = por %p1242_p8, %p1241_p7 }
 0x13f   :  { %827 = vst [vmem:[#allocation9] sm:$0xff] %v996_v4 }
 0x140   :  { %v997_v8 = vpack.c.bf16 %v756_v7, %v754_v5  ;;  %p1244_p10 = pnand %p1243_p9, %p1237_p6 }
 0x142   :  { %828 = vst [vmem:[#allocation9 + $0x8] sm:$0xff] %v997_v8 }
 0x143   :  { %1247 = shalt.err (!%p1244_p10)
}
 0x144   :  { %866 = dma.vmem_to_hbm [thread:$0]  %s861_s17, 256, %s1375_s4, [#allocation10], %s1292_s12, %s1292_s12, %s1293_s13  }
 0x145   :  { %s1295_s20 = smov [#allocation11]  }
 0x146   :  { %s872_s21 = sshll.u32 %s1295_s20, 4  ;;  %s873_s21 = int_to_ptr.vmem [resolvable:$true] %s872_s21 }
 0x147   :  { %s1256_s4 = scalar_lea.vmem %s873_s21, 256  ;;  %p1261_p12 = scmp.lt.s32.totalorder %s873_s21, %s873_s21 }
 0x148   :  { %p1257_p11 = scmp.ne.s32.totalorder %s873_s21, %s1256_s4  ;;  %p1262_p13 = scmp.lt.s32.totalorder %s1256_s4, %s1256_s4 }
 0x14a   :  { %p1263_p0 = por %p1262_p13, %p1261_p12 }
 0x14c   :  { %p1264_p1 = pnand %p1263_p0, %p1257_p11 }
 0x16a   :  { %v792_v9 = vpop.f32.mrf.mxu0 }
 0x16b   :  { %v793_v11 = vadd.f32 %v792_v9, %v1345_v42 }
 0x16c   :  { %v794_v10 = vpop.f32.mrf.mxu0 }
 0x16d   :  { %v795_v12 = vadd.f32 %v794_v10, %v1347_v44 }
 0x16e   :  { %v796_v13 = vpop.f32.mrf.mxu0 }
 0x16f   :  { %v998_v14 = vpack.c.bf16 %v795_v12, %v793_v11  ;;  %v797_v16 = vadd.f32 %v796_v13, %v1345_v42 }
 0x170   :  { %v798_v15 = vpop.f32.mrf.mxu0 }
 0x171   :  { %841 = vst [vmem:[#allocation11] sm:$0xff] %v998_v14  ;;  %v799_v17 = vadd.f32 %v798_v15, %v1347_v44 }
 0x173   :  { %v999_v18 = vpack.c.bf16 %v799_v17, %v797_v16 }
 0x175   :  { %842 = vst [vmem:[#allocation11 + $0x8] sm:$0xff] %v999_v18 }
 0x176   :  { %1267 = shalt.err (!%p1264_p1)
}
 0x177   :  { %878 = dma.vmem_to_hbm [thread:$0]  %s873_s21, 256, %s1376_s5, [#allocation10], %s1292_s12, %s1292_s12, %s1293_s13  }
 0x178   :  { %1280 = dma.done.wait [#allocation4], 256  }
 0x179   :  { %1281 = vsyncadd [#allocation4], 4294967040 }
 0x17a   :  { %1282 = dma.done.wait [#allocation10], 512  }
 0x17b   :  { %1283 = vsyncadd [#allocation10], 4294966784 }
 0x17c   :  { %888 = vsyncpa [#allocation3], 1 }
 0x17d   :  { %889 = vsyncpa [#allocation6], 1 }
 0x17e   :  { %890 = vsyncpa [#allocation4], 1 }
 0x17f   :  { %891 = vsyncpa [#allocation10], 1 }

</bundles_post_ra>
